<compile_context>
chip_gen: v7x
topology: tpu7x:2x2x1
jax: 0.10.0
libtpu: 0.0.40
codegen_flags: <defaults>
</compile_context>

<pallas_src>
import jax
import jax.numpy as jnp
from jax.experimental import pallas as pl
from jax.experimental.pallas import tpu as pltpu


OUT_FEATURES = 2      # fc4 out_features in the PyTorch module
OUT_PAD = 128         # lane-dense output width (sliced back to OUT_FEATURES)
MAX_ROW_TILE = 512    # batch row tile, sized for v7x's 64 MiB VMEM budget


def _round_up(n, m):
    return ((n + m - 1) // m) * m


def net_kernel(x_ref, w1_ref, b1_ref, w2_ref, b2_ref, w3s_ref, c_ref, w4_ref,
               alpha_ref, o_ref):
    """One batch tile of the Net forward pass.

    Weights may be bf16 (MXU inputs only); elementwise math stays f32.
    w3s_ref holds 2*fc3.weight.T (scale folded in at pack time);
    c_ref holds alpha*(r2 - sum(fc3.weight^2, dim=1).T), precomputed outside.
    """
    mm_dtype = w1_ref.dtype
    alpha = alpha_ref[0]

    x = x_ref[...].astype(mm_dtype)

    # fc1 + relu
    h1 = jnp.dot(x, w1_ref[...], preferred_element_type=jnp.float32) + b1_ref[...]
    h1 = jnp.maximum(h1, 0.0)

    # fc2 + relu
    h2 = jnp.dot(h1.astype(mm_dtype), w2_ref[...],
                 preferred_element_type=jnp.float32) + b2_ref[...]
    h2 = jnp.maximum(h2, 0.0)

    # knn: k = alpha*(r2 - mm) - alpha*xx + h2 @ (2*W3^T), then relu
    xx = jnp.sum(h2 * h2, axis=1, keepdims=True)                 # (tm, 1) f32
    fc3 = jnp.dot(h2.astype(mm_dtype), w3s_ref[...],
                  preferred_element_type=jnp.float32)             # (tm, F)
    h3 = jnp.maximum(c_ref[...] - alpha * xx + fc3, 0.0)

    # fc4 (no bias), lane-padded to OUT_PAD columns (extra columns are zero)
    o_ref[...] = jnp.dot(h3.astype(mm_dtype), w4_ref[...],
                         preferred_element_type=jnp.float32).astype(o_ref.dtype)


@jax.jit
def net_forward(x, packed, alpha, r2):
    w1t, b1, w2t, b2, w3t2, mm, w4p = packed
    B, inputs = x.shape
    feats = w1t.shape[1]
    out_w = w4p.shape[1]

    tm = min(_round_up(B, 8), MAX_ROW_TILE)
    grid = (pl.cdiv(B, tm),)

    alpha32 = jnp.asarray(alpha, jnp.float32)
    r232 = jnp.asarray(r2, jnp.float32)
    c = (alpha32 * (r232 - mm)).astype(jnp.float32)     # (1, F), weight+scalar only
    alpha_vec = alpha32.reshape((1,))

    resident = lambda i: (0, 0)   # weights/biases: same block every grid step
    tiled = lambda i: (i, 0)      # activations/output: tiled over batch rows

    weight_bytes = sum(int(a.size) * int(a.dtype.itemsize)
                       for a in (w1t, b1, w2t, b2, w3t2, w4p)) + feats * 4
    vmem_needed = (2 * tm * inputs * 4        # x double buffer (f32)
                   + 2 * tm * out_w * 4       # out double buffer (f32)
                   + 8 * tm * feats * 4       # f32 intermediates
                   + weight_bytes)
    vmem_limit = int(min(max(4 * 1024 * 1024, 2 * vmem_needed),
                         96 * 1024 * 1024))

    flops = 2 * B * (inputs * feats + 2 * feats * feats + feats * out_w)
    bytes_accessed = int(x.size) * 4 + weight_bytes + B * out_w * 4

    out = pl.pallas_call(
        net_kernel,
        out_shape=jax.ShapeDtypeStruct((B, out_w), jnp.float32),
        grid=grid,
        in_specs=[
            pl.BlockSpec((tm, inputs), tiled),                    # x
            pl.BlockSpec(w1t.shape, resident),                    # fc1.weight.T
            pl.BlockSpec(b1.shape, resident),                     # fc1.bias
            pl.BlockSpec(w2t.shape, resident),                    # fc2.weight.T
            pl.BlockSpec(b2.shape, resident),                     # fc2.bias
            pl.BlockSpec(w3t2.shape, resident),                   # 2*fc3.weight.T
            pl.BlockSpec((1, feats), resident),                   # alpha*(r2-mm)
            pl.BlockSpec(w4p.shape, resident),                    # fc4.weight.T (padded)
            pl.BlockSpec(memory_space=pltpu.MemorySpace.SMEM),    # alpha scalar
        ],
        out_specs=pl.BlockSpec((tm, out_w), tiled),
        compiler_params=pltpu.CompilerParams(
            dimension_semantics=("parallel",),
            vmem_limit_bytes=vmem_limit,
        ),
        cost_estimate=pl.CostEstimate(
            flops=flops, transcendentals=0, bytes_accessed=bytes_accessed),
    )(x, w1t, b1, w2t, b2, w3t2, c, w4p, alpha_vec)

    return out[:, :OUT_FEATURES]


def init_params(key, inputs, features):
    """Raw parameters matching the PyTorch Linear shapes (stored transposed)."""
    ks = jax.random.split(key, 6)
    w1t = jax.random.normal(ks[0], (inputs, features), jnp.float32) * 0.1
    b1 = jax.random.normal(ks[1], (1, features), jnp.float32) * 0.1
    w2t = jax.random.normal(ks[2], (features, features), jnp.float32) * 0.1
    b2 = jax.random.normal(ks[3], (1, features), jnp.float32) * 0.1
    w3t = jax.random.normal(ks[4], (features, features), jnp.float32) * 0.1   # fc3 (no bias)
    w4t = jax.random.normal(ks[5], (features, OUT_FEATURES), jnp.float32) * 0.1  # fc4 (no bias)
    return (w1t, b1, w2t, b2, w3t, w4t)


def pack_params(raw, use_bf16=True):
    """One-time weight transforms: fold 2x into fc3, precompute mm,
    lane-pad fc4 to OUT_PAD columns, optionally cast MXU inputs to bf16."""
    w1t, b1, w2t, b2, w3t, w4t = raw
    feats = w3t.shape[0]
    mm = jnp.sum(w3t * w3t, axis=0, keepdims=True)        # (1, F), kept f32
    w3t_scaled = 2.0 * w3t                                # exact (power of two)
    w4_pad = jnp.zeros((feats, OUT_PAD), jnp.float32).at[:, :w4t.shape[1]].set(w4t)
    mdt = jnp.bfloat16 if use_bf16 else jnp.float32
    return (w1t.astype(mdt), b1.astype(jnp.float32),
            w2t.astype(mdt), b2.astype(jnp.float32),
            w3t_scaled.astype(mdt), mm, w4_pad.astype(mdt))


def net_reference(x, raw, alpha, r2):
    w1t, b1, w2t, b2, w3t, w4t = raw
    h1 = jnp.maximum(x @ w1t + b1, 0.0)
    h2 = jnp.maximum(h1 @ w2t + b2, 0.0)
    xx = jnp.sum(h2 * h2, axis=1, keepdims=True)
    mm = jnp.sum(w3t * w3t, axis=0, keepdims=True)
    k = alpha * (r2 - mm - xx) + 2.0 * (h2 @ w3t)
    h3 = jnp.maximum(k, 0.0)
    return h3 @ w4t


if __name__ == "__main__":
    B, INPUTS, FEATURES = 8, 16, 32
    alpha, r2 = 0.5, 1.0

    key = jax.random.PRNGKey(0)
    kx, kp = jax.random.split(key)
    x = jax.random.normal(kx, (B, INPUTS), jnp.float32)
    raw = init_params(kp, INPUTS, FEATURES)
    ref = net_reference(x, raw, alpha, r2)

    # f32 MXU path: tight numerical check against the reference.
    out_f32 = jax.block_until_ready(
        net_forward(x, pack_params(raw, use_bf16=False), alpha, r2))
    assert out_f32.shape == (B, OUT_FEATURES)
    assert jnp.allclose(out_f32, ref, atol=1e-3, rtol=1e-3), "f32 mismatch vs reference"

    # bf16 MXU path (default for v6e/v7x): looser tolerance for the cast.
    out_bf16 = jax.block_until_ready(
        net_forward(x, pack_params(raw, use_bf16=True), alpha, r2))
    assert out_bf16.shape == (B, OUT_FEATURES)
    assert jnp.allclose(out_bf16, ref, atol=3e-2, rtol=3e-2), "bf16 mismatch vs reference"

    print("KERNEL_OK")
</pallas_src>

<mosaic_0001>
module attributes {stable_mosaic.version = 11 : i64} {
  func.func @net_kernel(%arg0: i32, %arg1: memref<8x16xf32, #tpu.memory_space<vmem>>, %arg2: memref<16x32xf32, #tpu.memory_space<vmem>>, %arg3: memref<1x32xf32, #tpu.memory_space<vmem>>, %arg4: memref<32x32xf32, #tpu.memory_space<vmem>>, %arg5: memref<1x32xf32, #tpu.memory_space<vmem>>, %arg6: memref<32x32xf32, #tpu.memory_space<vmem>>, %arg7: memref<1x32xf32, #tpu.memory_space<vmem>>, %arg8: memref<32x128xf32, #tpu.memory_space<vmem>>, %arg9: memref<1xf32, #tpu.memory_space<smem>>, %arg10: memref<8x128xf32, #tpu.memory_space<vmem>>) attributes {dimension_semantics = [#tpu.dimension_semantics<parallel>], iteration_bounds = array<i64: 1>, scalar_prefetch = 0 : i64, scratch_operands = 0 : i64, tpu.core_type = #tpu.core_type<tc>, window_params = [{transform_indices = @transform_0, window_bounds = array<i64: 8, 16>}, {pipeline_mode = #tpu.pipeline_mode<synchronous>, transform_indices = @transform_1, window_bounds = array<i64: 16, 32>}, {pipeline_mode = #tpu.pipeline_mode<synchronous>, transform_indices = @transform_2, window_bounds = array<i64: 1, 32>}, {pipeline_mode = #tpu.pipeline_mode<synchronous>, transform_indices = @transform_3, window_bounds = array<i64: 32, 32>}, {pipeline_mode = #tpu.pipeline_mode<synchronous>, transform_indices = @transform_4, window_bounds = array<i64: 1, 32>}, {pipeline_mode = #tpu.pipeline_mode<synchronous>, transform_indices = @transform_5, window_bounds = array<i64: 32, 32>}, {pipeline_mode = #tpu.pipeline_mode<synchronous>, transform_indices = @transform_6, window_bounds = array<i64: 1, 32>}, {pipeline_mode = #tpu.pipeline_mode<synchronous>, transform_indices = @transform_7, window_bounds = array<i64: 32, 128>}, {transform_indices = @transform_8, window_bounds = array<i64: 1>}, {transform_indices = @transform_9, window_bounds = array<i64: 8, 128>}]} {
    %c0 = arith.constant 0 : index
    %0 = memref.load %arg9[%c0] : memref<1xf32, #tpu.memory_space<smem>>
    %c0_0 = arith.constant 0 : index
    %c0_1 = arith.constant 0 : index
    %1 = vector.load %arg1[%c0_0, %c0_1] : memref<8x16xf32, #tpu.memory_space<vmem>>, vector<8x16xf32>
    %c0_2 = arith.constant 0 : index
    %c0_3 = arith.constant 0 : index
    %2 = vector.load %arg2[%c0_2, %c0_3] : memref<16x32xf32, #tpu.memory_space<vmem>>, vector<16x32xf32>
    %cst = arith.constant dense<0.000000e+00> : vector<8x32xf32>
    %3 = tpu.matmul %1, %2, %cst {dimension_numbers = #tpu.dot_dimension_numbers<[1], [0], [0], [1], [0, 0, 1, 1], [], []>} : vector<8x16xf32>, vector<16x32xf32>, vector<8x32xf32> -> vector<8x32xf32>
    %c0_4 = arith.constant 0 : index
    %c0_5 = arith.constant 0 : index
    %4 = vector.load %arg3[%c0_4, %c0_5] : memref<1x32xf32, #tpu.memory_space<vmem>>, vector<1x32xf32>
    %5 = vector.broadcast %4 : vector<1x32xf32> to vector<8x32xf32>
    %6 = arith.addf %3, %5 : vector<8x32xf32>
    %cst_6 = arith.constant 0.000000e+00 : f32
    %7 = vector.broadcast %cst_6 : f32 to vector<8x32xf32>
    %8 = arith.maximumf %6, %7 : vector<8x32xf32>
    %c0_7 = arith.constant 0 : index
    %c0_8 = arith.constant 0 : index
    %9 = vector.load %arg4[%c0_7, %c0_8] : memref<32x32xf32, #tpu.memory_space<vmem>>, vector<32x32xf32>
    %cst_9 = arith.constant dense<0.000000e+00> : vector<8x32xf32>
    %10 = tpu.matmul %8, %9, %cst_9 {dimension_numbers = #tpu.dot_dimension_numbers<[1], [0], [0], [1], [0, 0, 1, 1], [], []>} : vector<8x32xf32>, vector<32x32xf32>, vector<8x32xf32> -> vector<8x32xf32>
    %c0_10 = arith.constant 0 : index
    %c0_11 = arith.constant 0 : index
    %11 = vector.load %arg5[%c0_10, %c0_11] : memref<1x32xf32, #tpu.memory_space<vmem>>, vector<1x32xf32>
    %12 = vector.broadcast %11 : vector<1x32xf32> to vector<8x32xf32>
    %13 = arith.addf %10, %12 : vector<8x32xf32>
    %cst_12 = arith.constant 0.000000e+00 : f32
    %14 = vector.broadcast %cst_12 : f32 to vector<8x32xf32>
    %15 = arith.maximumf %13, %14 : vector<8x32xf32>
    %16 = arith.mulf %15, %15 : vector<8x32xf32>
    %cst_13 = arith.constant dense<0.000000e+00> : vector<8xf32>
    %17 = vector.multi_reduction <add>, %16, %cst_13 [1] : vector<8x32xf32> to vector<8xf32>
    %18 = vector.shape_cast %17 : vector<8xf32> to vector<8x1xf32>
    %c0_14 = arith.constant 0 : index
    %c0_15 = arith.constant 0 : index
    %19 = vector.load %arg6[%c0_14, %c0_15] : memref<32x32xf32, #tpu.memory_space<vmem>>, vector<32x32xf32>
    %cst_16 = arith.constant dense<0.000000e+00> : vector<8x32xf32>
    %20 = tpu.matmul %15, %19, %cst_16 {dimension_numbers = #tpu.dot_dimension_numbers<[1], [0], [0], [1], [0, 0, 1, 1], [], []>} : vector<8x32xf32>, vector<32x32xf32>, vector<8x32xf32> -> vector<8x32xf32>
    %c0_17 = arith.constant 0 : index
    %c0_18 = arith.constant 0 : index
    %21 = vector.load %arg7[%c0_17, %c0_18] : memref<1x32xf32, #tpu.memory_space<vmem>>, vector<1x32xf32>
    %22 = vector.broadcast %0 : f32 to vector<8x1xf32>
    %23 = arith.mulf %22, %18 : vector<8x1xf32>
    %24 = vector.broadcast %21 : vector<1x32xf32> to vector<8x32xf32>
    %25 = vector.broadcast %23 : vector<8x1xf32> to vector<8x32xf32>
    %26 = arith.subf %24, %25 : vector<8x32xf32>
    %27 = arith.addf %26, %20 : vector<8x32xf32>
    %cst_19 = arith.constant 0.000000e+00 : f32
    %28 = vector.broadcast %cst_19 : f32 to vector<8x32xf32>
    %29 = arith.maximumf %27, %28 : vector<8x32xf32>
    %c0_20 = arith.constant 0 : index
    %c0_21 = arith.constant 0 : index
    %30 = vector.load %arg8[%c0_20, %c0_21] : memref<32x128xf32, #tpu.memory_space<vmem>>, vector<32x128xf32>
    %cst_22 = arith.constant dense<0.000000e+00> : vector<8x128xf32>
    %31 = tpu.matmul %29, %30, %cst_22 {dimension_numbers = #tpu.dot_dimension_numbers<[1], [0], [0], [1], [0, 0, 1, 1], [], []>} : vector<8x32xf32>, vector<32x128xf32>, vector<8x128xf32> -> vector<8x128xf32>
    %c0_23 = arith.constant 0 : index
    %c0_24 = arith.constant 0 : index
    %32 = vector.load %arg10[%c0_23, %c0_24] : memref<8x128xf32, #tpu.memory_space<vmem>>, vector<8x128xf32>
    tpu.vector_store %arg10[%c0_23, %c0_24], %31 {strides = array<i32>} : memref<8x128xf32, #tpu.memory_space<vmem>>, vector<8x128xf32>,
    return
  }
  func.func @transform_0(%arg0: i32) -> (i32, i32) {
    %c0_i32 = arith.constant 0 : i32
    %c0_i32_0 = arith.constant 0 : i32
    return %arg0, %c0_i32 : i32, i32
  }
  func.func @transform_1(%arg0: i32) -> (i32, i32) {
    %c0_i32 = arith.constant 0 : i32
    %c0_i32_0 = arith.constant 0 : i32
    %c0_i32_1 = arith.constant 0 : i32
    return %c0_i32, %c0_i32_0 : i32, i32
  }
  func.func @transform_2(%arg0: i32) -> (i32, i32) {
    %c0_i32 = arith.constant 0 : i32
    %c0_i32_0 = arith.constant 0 : i32
    %c0_i32_1 = arith.constant 0 : i32
    return %c0_i32, %c0_i32_0 : i32, i32
  }
  func.func @transform_3(%arg0: i32) -> (i32, i32) {
    %c0_i32 = arith.constant 0 : i32
    %c0_i32_0 = arith.constant 0 : i32
    %c0_i32_1 = arith.constant 0 : i32
    return %c0_i32, %c0_i32_0 : i32, i32
  }
  func.func @transform_4(%arg0: i32) -> (i32, i32) {
    %c0_i32 = arith.constant 0 : i32
    %c0_i32_0 = arith.constant 0 : i32
    %c0_i32_1 = arith.constant 0 : i32
    return %c0_i32, %c0_i32_0 : i32, i32
  }
  func.func @transform_5(%arg0: i32) -> (i32, i32) {
    %c0_i32 = arith.constant 0 : i32
    %c0_i32_0 = arith.constant 0 : i32
    %c0_i32_1 = arith.constant 0 : i32
    return %c0_i32, %c0_i32_0 : i32, i32
  }
  func.func @transform_6(%arg0: i32) -> (i32, i32) {
    %c0_i32 = arith.constant 0 : i32
    %c0_i32_0 = arith.constant 0 : i32
    %c0_i32_1 = arith.constant 0 : i32
    return %c0_i32, %c0_i32_0 : i32, i32
  }
  func.func @transform_7(%arg0: i32) -> (i32, i32) {
    %c0_i32 = arith.constant 0 : i32
    %c0_i32_0 = arith.constant 0 : i32
    %c0_i32_1 = arith.constant 0 : i32
    return %c0_i32, %c0_i32_0 : i32, i32
  }
  func.func @transform_8(%arg0: i32) -> i32 {
    %c0_i32 = arith.constant 0 : i32
    %c0_i32_0 = arith.constant 0 : i32
    return %c0_i32 : i32
  }
  func.func @transform_9(%arg0: i32) -> (i32, i32) {
    %c0_i32 = arith.constant 0 : i32
    %c0_i32_0 = arith.constant 0 : i32
    return %arg0, %c0_i32 : i32, i32
  }
}

</mosaic_0001>

<bundles_post_ra>
// kernel: net_forward.1
= control target key start
LH: loop header
LB: loop body
LE: loop exit
PB: predicated region body
PF: predicated region fallthrough
CT: control target
= control target key end

     0   :  { %15 = vsyncpa [#allocation4], 0  ;;  %s776_s0 = inlined_call_operand.hbm [shape: f32[8,16], index: 0, kind: input, shape index: {}]   ;;  %s777_s1 = inlined_call_operand.hbm [shape: f32[16,32], index: 1, kind: input, shape index: {}]   ;;  %s778_s2 = inlined_call_operand.vmem [shape: f32[1,32], index: 2, kind: input, shape index: {}]   ;;  %s779_s3 = inlined_call_operand.hbm [shape: f32[32,32], index: 3, kind: input, shape index: {}]   ;;  %s780_s4 = inlined_call_operand.vmem [shape: f32[1,32], index: 4, kind: input, shape index: {}]   ;;  %s781_s5 = inlined_call_operand.vmem [shape: f32[32,32], index: 5, kind: input, shape index: {}]   ;;  %s782_s6 = inlined_call_operand.vmem [shape: f32[1,32], index: 6, kind: input, shape index: {}]   ;;  %s783_s7 = inlined_call_operand.hbm [shape: f32[32,128], index: 7, kind: input, shape index: {}]   ;;  %s784_s8 = inlined_call_operand.<no memory space> [shape: f32[1], index: 8, kind: input, shape index: {}]   ;;  %s785_s9 = inlined_call_operand.vmem [shape: f32[8,128], index: 9, kind: output, shape index: {}]  }
   0x1   :  { %16 = vsyncpa [#allocation6], 0 }
   0x2   :  { %17 = vsyncpa [#allocation9], 0  ;;  %s625_s30 = smov [#allocation5]   ;;  %s531_s13 = scalar_lea.hbm %s777_s1, 256 }
   0x3   :  { %s33_s10 = sshll.u32 %s625_s30, 4  ;;  %p532_p0 = scmp.ne.s32.totalorder %s777_s1, %s531_s13  ;;  %s34_s10 = int_to_ptr.vmem [resolvable:$true] %s33_s10 }
   0x4   :  { %p535_p1 = scmp.lt.u32.totalorder %s531_s13, %s777_s1 }
   0x6   :  { %p537_p2 = pnand %p535_p1, %p532_p0 }
   0x8   :  { %540 = shalt.err (!%p537_p2)
}
   0x9   :  { %s541_s18 = scalar_lea.vmem %s34_s10, 256  ;;  %p546_p4 = scmp.lt.s32.totalorder %s34_s10, %s34_s10 }
   0xa   :  { %p542_p3 = scmp.ne.s32.totalorder %s34_s10, %s541_s18  ;;  %p547_p5 = scmp.lt.s32.totalorder %s541_s18, %s541_s18 }
   0xc   :  { %p548_p6 = por %p547_p5, %p546_p4 }
   0xe   :  { %p549_p7 = pnand %p548_p6, %p542_p3 }
  0x10   :  { %552 = shalt.err (!%p549_p7)
}
  0x11   :  { %s626_s19 = smov 128   ;;  %s627_s20 = smov 8  }
  0x12   :  { %39 = dma.hbm_to_vmem [thread:$0]  %s777_s1, 256, %s34_s10, [#allocation6], %s626_s19, %s626_s19, %s627_s20  }
  0x13   :  { %s628_s23 = smov [#allocation3]   ;;  %s629_s25 = smov [#allocation7]  }
  0x14   :  { %s24_s24 = sshll.u32 %s628_s23, 4  ;;  %s47_s26 = sshll.u32 %s629_s25, 4  ;;  %s25_s24 = int_to_ptr.vmem [resolvable:$true] %s24_s24  ;;  %s48_s26 = int_to_ptr.vmem [resolvable:$true] %s47_s26 }
  0x15   :  { %s553_s29 = scalar_lea.hbm %s776_s0, 128 }
  0x16   :  { %p554_p8 = scmp.ne.s32.totalorder %s776_s0, %s553_s29  ;;  %p557_p9 = scmp.lt.u32.totalorder %s553_s29, %s776_s0 }
  0x18   :  { %p559_p10 = pnand %p557_p9, %p554_p8 }
  0x1a   :  { %562 = shalt.err (!%p559_p10)
}
  0x1b   :  { %s563_s1 = scalar_lea.vmem %s25_s24, 128  ;;  %p568_p12 = scmp.lt.s32.totalorder %s25_s24, %s25_s24 }
  0x1c   :  { %p564_p11 = scmp.ne.s32.totalorder %s25_s24, %s563_s1  ;;  %p569_p13 = scmp.lt.s32.totalorder %s563_s1, %s563_s1 }
  0x1e   :  { %p570_p0 = por %p569_p13, %p568_p12 }
  0x20   :  { %p571_p1 = pnand %p570_p0, %p564_p11 }
  0x22   :  { %574 = shalt.err (!%p571_p1)
}
  0x23   :  { %27 = dma.hbm_to_vmem [thread:$0]  %s776_s0, 128, %s25_s24, [#allocation4]  }
  0x24   :  { %s575_s17 = scalar_lea.hbm %s779_s3, 512 }
  0x25   :  { %p576_p2 = scmp.ne.s32.totalorder %s779_s3, %s575_s17  ;;  %p579_p3 = scmp.lt.u32.totalorder %s575_s17, %s779_s3 }
  0x27   :  { %p581_p4 = pnand %p579_p3, %p576_p2 }
  0x29   :  { %584 = shalt.err (!%p581_p4)
}
  0x2a   :  { %s585_s25 = scalar_lea.vmem %s48_s26, 512  ;;  %p590_p6 = scmp.lt.s32.totalorder %s48_s26, %s48_s26 }
  0x2b   :  { %p586_p5 = scmp.ne.s32.totalorder %s48_s26, %s585_s25  ;;  %p591_p7 = scmp.lt.s32.totalorder %s585_s25, %s585_s25 }
  0x2d   :  { %p592_p8 = por %p591_p7, %p590_p6 }
  0x2f   :  { %p593_p9 = pnand %p592_p8, %p586_p5 }
  0x31   :  { %596 = shalt.err (!%p593_p9)
}
  0x32   :  { %53 = dma.hbm_to_vmem [thread:$0]  %s779_s3, 512, %s48_s26, [#allocation6], %s626_s19, %s626_s19, %s627_s20  }
  0x33   :  { %s630_s27 = smov [#allocation8]   ;;  %s597_s11 = scalar_lea.hbm %s783_s7, 512 }
  0x34   :  { %s65_s28 = sshll.u32 %s630_s27, 4  ;;  %p598_p10 = scmp.ne.s32.totalorder %s783_s7, %s597_s11  ;;  %s66_s28 = int_to_ptr.vmem [resolvable:$true] %s65_s28 }
  0x35   :  { %p601_p11 = scmp.lt.u32.totalorder %s597_s11, %s783_s7 }
  0x37   :  { %p603_p12 = pnand %p601_p11, %p598_p10 }
  0x39   :  { %606 = shalt.err (!%p603_p12)
}
  0x3a   :  { %s607_s14 = scalar_lea.vmem %s66_s28, 512  ;;  %p612_p0 = scmp.lt.s32.totalorder %s66_s28, %s66_s28 }
  0x3b   :  { %p608_p13 = scmp.ne.s32.totalorder %s66_s28, %s607_s14  ;;  %p613_p1 = scmp.lt.s32.totalorder %s607_s14, %s607_s14 }
  0x3d   :  { %p614_p2 = por %p613_p1, %p612_p0 }
  0x3f   :  { %p615_p3 = pnand %p614_p2, %p608_p13 }
  0x41   :  { %618 = shalt.err (!%p615_p3)
}
  0x42   :  { %71 = dma.hbm_to_vmem [thread:$0]  %s783_s7, 512, %s66_s28, [#allocation9], %s626_s19, %s626_s19, %s627_s20  }
  0x43   :  { %619 = dma.done.wait [#allocation4], 128  }
  0x44   :  { %620 = vsyncadd [#allocation4], 4294967168 }
  0x45   :  { %621 = dma.done.wait [#allocation6], 768  }
  0x46   :  { %622 = vsyncadd [#allocation6], 4294966528 }
  0x47   :  { %623 = dma.done.wait [#allocation9], 512  }
  0x48   :  { %624 = vsyncadd [#allocation9], 4294966784  ;;  %v631_v0 = vmov 0.0|0.0   ;;  %vm632_vm0 = vmmov 0   ;;  %v633_v1 = vmov 0.0   ;;  %v88_v2 = vld [vmem:[#allocation5] sm:$0xff]  ;;  %v340_v37 = vstv %s784_s8 }
  0x49   :  { %501 = vmatprep.subr.bf16.mxu0 %v631_v0  ;;  %465 = vmatprep.mubr.msk.f32.mxu0 %vm632_vm0, %v633_v1  ;;  %v89_v3 = vld [vmem:[#allocation5 + $0x8] sm:$0xff]  ;;  %v172_v5 = vld [vmem:[#allocation7] sm:$0xff]  ;;  %v173_v6 = vld [vmem:[#allocation7 + $0x8] sm:$0xff]  ;;  %vm97_vm1 = vcmask 130048   ;;  %vm183_vm2 = vcmask 261120  }
  0x4a   :  { %504 = vmatprep.subr.bf16.mxu1 %v631_v0  ;;  %476 = vmatprep.mubr.msk.f32.mxu1 %vm632_vm0, %v633_v1  ;;  %v502_v4 = vpack.c.bf16 %v89_v3, %v88_v2  ;;  %v505_v7 = vpack.c.bf16 %v173_v6, %v172_v5  ;;  %v87_v8 = vld [vmem:[#allocation3] sm:$0xff]  ;;  %v174_v9 = vld [vmem:[#allocation7 + $0x10] sm:$0xff]  ;;  %v175_v10 = vld [vmem:[#allocation7 + $0x18] sm:$0xff] }
  0x4b   :  { %v508_v11 = vpack.c.bf16 %v175_v10, %v174_v9  ;;  %v262_v12 = vld [vmem:[%s781_s5] sm:$0xff]  ;;  %v263_v13 = vld [vmem:[%s781_s5 + $0x8] sm:$0xff]  ;;  %v264_v20 = vld [vmem:[%s781_s5 + $0x10] sm:$0xff] }
  0x4c   :  { %503 = vmatpush3.bf16.msra.mxu0 %v502_v4  ;;  %506 = vmatpush3.bf16.msra.mxu1 %v505_v7  ;;  %v511_v14 = vpack.c.bf16 %v263_v13, %v262_v12  ;;  %v436_v15 = vld [vmem:[%s778_s2] ss:$0 sm:$0xff]  ;;  %v265_v21 = vld [vmem:[%s781_s5 + $0x18] sm:$0xff]  ;;  %v353_v33 = vld [vmem:[#allocation8 + $0x10] sm:$0xff] }
  0x4d   :  { %510 = vmatprep.subr.bf16.mxu0 %v631_v0  ;;  %507 = vmatprep.subr.bf16.mxu1 %v631_v0  ;;  %v514_v22 = vpack.c.bf16 %v265_v21, %v264_v20  ;;  %v438_v23 = vld [vmem:[%s780_s4] ss:$0 sm:$0xff]  ;;  %v351_v30 = vld [vmem:[#allocation8] sm:$0xff]  ;;  %v354_v34 = vld [vmem:[#allocation8 + $0x18] sm:$0xff] }
  0x4e   :  { %v352_v31 = vld [vmem:[#allocation8 + $0x8] sm:$0xff]  ;;  %v520_v35 = vpack.c.bf16 %v354_v34, %v353_v33 }
  0x4f   :  { %466 = vmatmul.mubr.msk.f32.vlgmr.msra.gmra.mrb[0].mxu0 %vm97_vm1, %v87_v8  ;;  %v517_v32 = vpack.c.bf16 %v352_v31, %v351_v30  ;;  %v441_v39 = vld [vmem:[%s782_s6] ss:$0 sm:$0xff] }
  0x50   :  { %487 = vmatprep.mubr.msk.f32.mxu0 %vm632_vm0, %v633_v1  ;;  %509 = vmatpush3.bf16.msra.mxu1 %v508_v11 }
  0x51   :  { %516 = vmatprep.subr.bf16.mxu1 %v631_v0  ;;  %512 = vmatpush3.bf16.msra.mxu0 %v511_v14 }
  0x52   :  { %513 = vmatprep.subr.bf16.mxu0 %v631_v0 }
  0x55   :  { %515 = vmatpush3.bf16.msra.mxu0 %v514_v22 }
 0x122   :  { %v167_v16 = vpop.f32.mrb[0].mxu0 }
 0x123   :  { %v168_v17 = vadd.f32 %v436_v15, %v167_v16  ;;  %v467_v18 = vpop.f32.mrb[1].mxu0 }
 0x125   :  { %v171_v19 = vmax.f32 %v168_v17, 0.0 }
 0x127   :  { %477 = vmatmul.mubr.msk.f32.vlgmr.msra.gmra.mrb[0].mxu1 %vm183_vm2, %v171_v19 }
 0x128   :  { %498 = vmatprep.mubr.msk.f32.mxu1 %vm632_vm0, %v633_v1  ;;  %518 = vmatpush3.bf16.msra.mxu1 %v517_v32 }
 0x129   :  { %519 = vmatprep.subr.bf16.mxu1 %v631_v0 }
 0x12c   :  { %521 = vmatpush3.bf16.msra.mxu1 %v520_v35 }
 0x1fa   :  { %v253_v24 = vpop.f32.mrb[0].mxu1 }
 0x1fb   :  { %v254_v25 = vadd.f32 %v438_v23, %v253_v24  ;;  %v478_v26 = vpop.f32.mrb[1].mxu1 }
 0x1fd   :  { %v257_v27 = vmax.f32 %v254_v25, 0.0 }
 0x1ff   :  { %488 = vmatmul.mubr.msk.f32.vlgmr.msra.gmra.mrb[2].mxu0 %vm183_vm2, %v257_v27  ;;  %v258_v28 = vmul.f32 %v257_v27, %v257_v27 }
 0x201   :  { %v259_v29 = vsel %vm183_vm2, %v258_v28, 0.0 }
 0x202   :  { %260 = vadd.xlane.f32.xlu0 %v259_v29 }
 0x28f   :  { %v261_v36 = vpop.xlane.xlu0 %260 }
 0x290   :  { %v341_v38 = vmul.f32 %v340_v37, %v261_v36 }
 0x292   :  { %v348_v40 = vsub.f32 %v441_v39, %v341_v38 }
 0x2d2   :  { %v335_v41 = vpop.f32.mrb[2].mxu0 }
 0x2d3   :  { %v349_v42 = vadd.f32 %v348_v40, %v335_v41  ;;  %v489_v43 = vpop.f32.mrb[3].mxu0 }
 0x2d5   :  { %v350_v44 = vmax.f32 %v349_v42, 0.0 }
 0x2d7   :  { %499 = vmatmul.mubr.msk.f32.vlgmr.msra.gmra.mrb[2].mxu1 %vm183_vm2, %v350_v44 }
 0x3aa   :  { %v424_v45 = vpop.f32.mrb[2].mxu1 }
 0x3ab   :  { %428 = vst [vmem:[%s785_s9] sm:$0xff] %v424_v45  ;;  %v500_v46 = vpop.f32.mrb[3].mxu1 }
 0x3ac   :  { %433 = vsyncpa [#allocation4], 1 }
 0x3ad   :  { %434 = vsyncpa [#allocation6], 1 }
 0x3ae   :  { %435 = vsyncpa [#allocation9], 1 }

</bundles_post_ra>
